<compile_context>
chip_gen: v5e
topology: v5e:2x2
jax: 0.10.0
libtpu: 0.0.40
codegen_flags: <defaults>
</compile_context>

<pallas_src>
import functools

import jax
import jax.numpy as jnp
from jax.experimental import pallas as pl
from jax.experimental.pallas import tpu as pltpu

_LANE = 128
_SUBLANE = 8


def _norm_loss_kernel(x_ref, y_ref, o_ref, acc_ref, *, n, tile_n,
                      tiles_per_split, needs_mask):
    s = pl.program_id(0)   # parallel split of the reduction axis (v7x megacore)
    k = pl.program_id(1)   # serial reduction within the split

    @pl.when(k == 0)
    def _():
        acc_ref[...] = jnp.zeros_like(acc_ref)

    d = x_ref[...].astype(jnp.float32) - y_ref[...].astype(jnp.float32)
    sq = d * d
    if needs_mask:
        # Mask the ragged tail and any fully out-of-range (clamped) overshoot tile.
        tile_idx = s * tiles_per_split + k
        col = tile_idx * tile_n + jax.lax.broadcasted_iota(
            jnp.int32, sq.shape, dimension=1)
        sq = jnp.where(col < n, sq, 0.0)

    acc_ref[...] += jnp.sum(sq, axis=-1, keepdims=True)

    @pl.when(k == tiles_per_split - 1)
    def _():
        o_ref[0] = acc_ref[...]


def norm_loss(x, y, *, tile_n=None, vmem_block_bytes=4 * 1024 * 1024):
    """Pallas implementation of NormLoss(norm=2, power=2).forward(x, y).

    x, y: arrays with leading batch dim (e.g. (B, C, H, W)). Returns (B, 1).
    """
    assert x.shape == y.shape, (x.shape, y.shape)
    b = x.shape[0]
    x2 = x.reshape(b, -1)
    y2 = y.reshape(b, -1)
    n = x2.shape[1]  # == C*H*W
    itemsize = jnp.dtype(x2.dtype).itemsize

    # Sublane-padded rows actually occupied in a VMEM tile.
    rows_padded = pl.cdiv(b, _SUBLANE) * _SUBLANE

    # Size the block by VMEM bytes (not a fixed small tile_n).
    if tile_n is None:
        tile_n = vmem_block_bytes // (rows_padded * itemsize)
    tile_n = max(_LANE, (tile_n // _LANE) * _LANE)
    tile_n = min(tile_n, pl.cdiv(n, _LANE) * _LANE)

    n_tiles = pl.cdiv(n, tile_n)
    # Outer "parallel" axis so v7x can use both TensorCores; no-op on v5e/v6e.
    num_splits = 2 if n_tiles >= 2 else 1
    tiles_per_split = pl.cdiv(n_tiles, num_splits)
    needs_mask = (n % tile_n != 0) or (num_splits * tiles_per_split != n_tiles)

    def in_map(s, k):
        # Clamp so an overshoot step (odd n_tiles split in two) re-reads the last
        # valid tile; its contribution is masked to zero inside the kernel.
        return (0, jnp.minimum(s * tiles_per_split + k, n_tiles - 1))

    kernel = functools.partial(
        _norm_loss_kernel,
        n=n,
        tile_n=tile_n,
        tiles_per_split=tiles_per_split,
        needs_mask=needs_mask,
    )

    block_vmem = rows_padded * tile_n * itemsize
    # 2 inputs x 2 pipeline buffers + output/scratch headroom; capped for v7x (64 MiB).
    vmem_limit = int(max(32 * 1024 * 1024, min(48 * 1024 * 1024, 6 * block_vmem)))

    partials = pl.pallas_call(
        kernel,
        out_shape=jax.ShapeDtypeStruct((num_splits, b, 1), jnp.float32),
        grid_spec=pltpu.PrefetchScalarGridSpec(
            num_scalar_prefetch=0,
            grid=(num_splits, tiles_per_split),
            in_specs=[
                pl.BlockSpec((b, tile_n), in_map),
                pl.BlockSpec((b, tile_n), in_map),
            ],
            out_specs=pl.BlockSpec((1, b, 1), lambda s, k: (s, 0, 0)),
            scratch_shapes=[pltpu.VMEM((b, 1), jnp.float32)],
        ),
        compiler_params=pltpu.CompilerParams(
            dimension_semantics=("parallel", "arbitrary"),
            vmem_limit_bytes=vmem_limit,
        ),
        cost_estimate=pl.CostEstimate(
            flops=3 * b * n,
            transcendentals=0,
            bytes_accessed=2 * b * n * itemsize + num_splits * b * 4,
        ),
    )(x2, y2)

    # Combine per-split partial sums in f32, scale by 1/N, cast like PyTorch output.
    out = (jnp.sum(partials, axis=0) * (1.0 / float(n))).astype(x.dtype)
    return out


def _reference(x, y):
    b = x.shape[0]
    d = x.reshape(b, -1).astype(jnp.float32) - y.reshape(b, -1).astype(jnp.float32)
    n = d.shape[1]
    return (jnp.sum(d * d, axis=1) / n).reshape(b, 1).astype(x.dtype)


if __name__ == "__main__":
    key = jax.random.PRNGKey(0)
    kx, ky = jax.random.split(key)
    B, C, H, W = 2, 4, 16, 16
    x = jax.random.normal(kx, (B, C, H, W), dtype=jnp.float32)
    y = jax.random.normal(ky, (B, C, H, W), dtype=jnp.float32)

    ref = _reference(x, y)

    # Default (bandwidth-sized) tiling: single big tile here.
    out = jax.block_until_ready(norm_loss(x, y))
    assert out.shape == (B, 1), out.shape
    assert jnp.allclose(out, ref, rtol=1e-5, atol=1e-5), (out, ref)

    # Multi-tile + two parallel splits (exercises accumulate-over-grid path).
    out2 = jax.block_until_ready(norm_loss(x, y, tile_n=256))
    assert jnp.allclose(out2, ref, rtol=1e-5, atol=1e-5), (out2, ref)

    # Ragged tail + overshoot tile (exercises in-kernel masking + index clamp).
    out3 = jax.block_until_ready(norm_loss(x, y, tile_n=384))
    assert jnp.allclose(out3, ref, rtol=1e-5, atol=1e-5), (out3, ref)

    print("KERNEL_OK")
</pallas_src>

<mosaic_0001>
module attributes {stable_mosaic.version = 11 : i64} {
  func.func @_norm_loss_kernel(%arg0: i32, %arg1: i32, %arg2: memref<2x1024xf32, #tpu.memory_space<vmem>>, %arg3: memref<2x1024xf32, #tpu.memory_space<vmem>>, %arg4: memref<1x2x1xf32, #tpu.memory_space<vmem>>, %arg5: memref<2x1xf32, #tpu.memory_space<vmem>>) attributes {dimension_semantics = [#tpu.dimension_semantics<parallel>, #tpu.dimension_semantics<arbitrary>], iteration_bounds = array<i64: 1, 1>, scalar_prefetch = 0 : i64, scratch_operands = 1 : i64, tpu.core_type = #tpu.core_type<tc>, window_params = [{transform_indices = @transform_0, window_bounds = array<i64: 2, 1024>}, {transform_indices = @transform_1, window_bounds = array<i64: 2, 1024>}, {transform_indices = @transform_2, window_bounds = array<i64: 1, 2, 1>}]} {
    %c0_i32 = arith.constant 0 : i32
    %0 = arith.cmpi eq, %arg1, %c0_i32 : i32
    %1 = arith.extui %0 : i1 to i32
    %c0_i32_0 = arith.constant 0 : i32
    %2 = arith.cmpi ne, %1, %c0_i32_0 : i32
    scf.if %2 {
      %cst_10 = arith.constant 0.000000e+00 : f32
      %15 = vector.broadcast %cst_10 : f32 to vector<2x1xf32>
      %c0_11 = arith.constant 0 : index
      %c0_12 = arith.constant 0 : index
      %16 = vector.load %arg5[%c0_11, %c0_12] : memref<2x1xf32, #tpu.memory_space<vmem>>, vector<2x1xf32>
      tpu.vector_store %arg5[%c0_11, %c0_12], %15 {strides = array<i32>} : memref<2x1xf32, #tpu.memory_space<vmem>>, vector<2x1xf32>,
    } else {
    }
    %c0 = arith.constant 0 : index
    %c0_1 = arith.constant 0 : index
    %3 = vector.load %arg2[%c0, %c0_1] : memref<2x1024xf32, #tpu.memory_space<vmem>>, vector<2x1024xf32>
    %c0_2 = arith.constant 0 : index
    %c0_3 = arith.constant 0 : index
    %4 = vector.load %arg3[%c0_2, %c0_3] : memref<2x1024xf32, #tpu.memory_space<vmem>>, vector<2x1024xf32>
    %5 = arith.subf %3, %4 : vector<2x1024xf32>
    %6 = arith.mulf %5, %5 : vector<2x1024xf32>
    %c0_4 = arith.constant 0 : index
    %c0_5 = arith.constant 0 : index
    %7 = vector.load %arg5[%c0_4, %c0_5] : memref<2x1xf32, #tpu.memory_space<vmem>>, vector<2x1xf32>
    %cst = arith.constant dense<0.000000e+00> : vector<2xf32>
    %8 = vector.multi_reduction <add>, %6, %cst [1] : vector<2x1024xf32> to vector<2xf32>
    %9 = vector.shape_cast %8 : vector<2xf32> to vector<2x1xf32>
    %10 = arith.addf %7, %9 : vector<2x1xf32>
    %c0_6 = arith.constant 0 : index
    %c0_7 = arith.constant 0 : index
    %11 = vector.load %arg5[%c0_6, %c0_7] : memref<2x1xf32, #tpu.memory_space<vmem>>, vector<2x1xf32>
    tpu.vector_store %arg5[%c0_6, %c0_7], %10 {strides = array<i32>} : memref<2x1xf32, #tpu.memory_space<vmem>>, vector<2x1xf32>,
    %c0_i32_8 = arith.constant 0 : i32
    %12 = arith.cmpi eq, %arg1, %c0_i32_8 : i32
    %13 = arith.extui %12 : i1 to i32
    %c0_i32_9 = arith.constant 0 : i32
    %14 = arith.cmpi ne, %13, %c0_i32_9 : i32
    scf.if %14 {
      %c0_10 = arith.constant 0 : index
      %c0_11 = arith.constant 0 : index
      %15 = vector.load %arg5[%c0_10, %c0_11] : memref<2x1xf32, #tpu.memory_space<vmem>>, vector<2x1xf32>
      %c0_12 = arith.constant 0 : index
      %c0_13 = arith.constant 0 : index
      %c0_14 = arith.constant 0 : index
      %16 = vector.load %arg4[%c0_12, %c0_13, %c0_14] : memref<1x2x1xf32, #tpu.memory_space<vmem>>, vector<1x2x1xf32>
      %17 = vector.shape_cast %16 : vector<1x2x1xf32> to vector<2x1xf32>
      %18 = vector.shape_cast %15 : vector<2x1xf32> to vector<1x2x1xf32>
      tpu.vector_store %arg4[%c0_12, %c0_13, %c0_14], %18 {strides = array<i32>} : memref<1x2x1xf32, #tpu.memory_space<vmem>>, vector<1x2x1xf32>,
    } else {
    }
    return
  }
  func.func @transform_0(%arg0: i32, %arg1: i32) -> (i32, i32) {
    %c1_i32 = arith.constant 1 : i32
    %0 = arith.muli %arg0, %c1_i32 : i32
    %1 = arith.addi %0, %arg1 : i32
    %c0_i32 = arith.constant 0 : i32
    %2 = arith.minsi %1, %c0_i32 : i32
    %c0_i32_0 = arith.constant 0 : i32
    %c0_i32_1 = arith.constant 0 : i32
    return %c0_i32_0, %2 : i32, i32
  }
  func.func @transform_1(%arg0: i32, %arg1: i32) -> (i32, i32) {
    %c1_i32 = arith.constant 1 : i32
    %0 = arith.muli %arg0, %c1_i32 : i32
    %1 = arith.addi %0, %arg1 : i32
    %c0_i32 = arith.constant 0 : i32
    %2 = arith.minsi %1, %c0_i32 : i32
    %c0_i32_0 = arith.constant 0 : i32
    %c0_i32_1 = arith.constant 0 : i32
    return %c0_i32_0, %2 : i32, i32
  }
  func.func @transform_2(%arg0: i32, %arg1: i32) -> (i32, i32, i32) {
    %c0_i32 = arith.constant 0 : i32
    %c0_i32_0 = arith.constant 0 : i32
    %c0_i32_1 = arith.constant 0 : i32
    return %arg0, %c0_i32, %c0_i32_0 : i32, i32, i32
  }
}

</mosaic_0001>

<bundles_post_ra>
// kernel: tpu_custom_call.1
= control target key start
LH: loop header
LB: loop body
LE: loop exit
PB: predicated region body
PF: predicated region fallthrough
CT: control target
= control target key end

     0   :  { %7 = vsyncpa [#allocation4], 0  ;;  %s224_s0 = inlined_call_operand.hbm [shape: f32[2,1024], index: 0, kind: input, shape index: {}]   ;;  %s225_s1 = inlined_call_operand.hbm [shape: f32[2,1024], index: 1, kind: input, shape index: {}]   ;;  %s226_s2 = inlined_call_operand.vmem [shape: f32[1,2,1], index: 2, kind: output, shape index: {}]  }
   0x1   :  { %s20_s11 = sshll.u32 %s224_s0, 4  ;;  %s21_s11 = int_to_ptr.hbm [resolvable:$true] %s20_s11 }
   0x2   :  { %8 = vsyncpa [#allocation6], 0  ;;  %s186_s12 = smov [#allocation3]   ;;  %s37_s16 = sshll.u32 %s225_s1, 4  ;;  %s38_s16 = int_to_ptr.hbm [resolvable:$true] %s37_s16 }
   0x3   :  { %s22_s13 = sshll.u32 %s186_s12, 4  ;;  %s187_s17 = smov [#allocation5]   ;;  %s23_s13 = int_to_ptr.vmem [resolvable:$true] %s22_s13 }
   0x4   :  { %25 = dma.hbm_to_vmem [thread:$0]  %s21_s11, 256, %s23_s13, [#allocation4]  }
   0x5   :  { %s39_s18 = sshll.u32 %s187_s17, 4  ;;  %s40_s18 = int_to_ptr.vmem [resolvable:$true] %s39_s18 }
   0x6   :  { %42 = dma.hbm_to_vmem [thread:$0]  %s38_s16, 256, %s40_s18, [#allocation6]  }
   0x7   :  { %182 = dma.done.wait [#allocation4], 256  }
   0x8   :  { %183 = vsyncadd [#allocation4], 4294967040 }
   0x9   :  { %184 = dma.done.wait [#allocation6], 256  }
   0xa   :  { %185 = vsyncadd [#allocation6], 4294967040  ;;  %vm63_vm0 = vcmask 1024   ;;  %v65_v0 = vld [vmem:[#allocation3] sm:$0xff]  ;;  %v66_v1 = vld [vmem:[#allocation3 + $0x8] sm:$0xff]  ;;  %v188_v3 = vmov 0.0  }
   0xb   :  { %v67_v2 = vld [vmem:[#allocation5] sm:$0xff]  ;;  %64 = vst.msk [vmem:[#allocation2] sm:$0x3] %vm63_vm0, %v188_v3  ;;  %v68_v4 = vld [vmem:[#allocation5 + $0x8] sm:$0xff]  ;;  %vm95_vm1 = vcmask 1041408  }
   0xc   :  { %v69_v5 = vsub.f32 %v65_v0, %v67_v2  ;;  %v70_v6 = vsub.f32 %v66_v1, %v68_v4 }
   0xe   :  { %v71_v7 = vmul.f32 %v69_v5, %v69_v5  ;;  %v72_v8 = vmul.f32 %v70_v6, %v70_v6 }
  0x10   :  { %76 = vst [vmem:[#allocation1] ss:$4 sm:$0xff] %v71_v7 }
  0x11   :  { %78 = vst [vmem:[#allocation1 + $0x20] ss:$4 sm:$0xff] %v72_v8 }
  0x12   :  { %v73_v32 = vld [vmem:[#allocation2] sm:$0x3] }
  0x17   :  { %v79_v9 = vld.sshfl [vmem:[#allocation1] sm:$0xff pattern:$0x73625140]  ;;  %v80_v10 = vld.sshfl [vmem:[#allocation1 + $0x8] sm:$0xff pattern:$0x73625140] }
  0x18   :  { %v81_v11 = vld.sshfl [vmem:[#allocation1 + $0x10] sm:$0xff pattern:$0x73625140]  ;;  %v82_v12 = vld.sshfl [vmem:[#allocation1 + $0x18] sm:$0xff pattern:$0x73625140] }
  0x19   :  { %v96_v13 = vsel %vm95_vm1, %v79_v9, 0.0  ;;  %v97_v14 = vsel %vm95_vm1, %v80_v10, 0.0  ;;  %v99_v15 = vsel %vm95_vm1, %v81_v11, 0.0  ;;  %v83_v16 = vld.sshfl [vmem:[#allocation1 + $0x20] sm:$0xff pattern:$0x73625140] }
  0x1a   :  { %v98_v17 = vadd.f32 %v97_v14, %v96_v13  ;;  %v101_v18 = vsel %vm95_vm1, %v82_v12, 0.0  ;;  %v84_v19 = vld.sshfl [vmem:[#allocation1 + $0x28] sm:$0xff pattern:$0x73625140]  ;;  %v103_v21 = vsel %vm95_vm1, %v83_v16, 0.0 }
  0x1b   :  { %v85_v22 = vld.sshfl [vmem:[#allocation1 + $0x30] sm:$0xff pattern:$0x73625140]  ;;  %v105_v24 = vsel %vm95_vm1, %v84_v19, 0.0 }
  0x1c   :  { %v100_v20 = vadd.f32 %v99_v15, %v98_v17  ;;  %v86_v25 = vld.sshfl [vmem:[#allocation1 + $0x38] sm:$0xff pattern:$0x73625140]  ;;  %v107_v27 = vsel %vm95_vm1, %v85_v22, 0.0 }
  0x1d   :  { %v109_v29 = vsel %vm95_vm1, %v86_v25, 0.0 }
  0x1e   :  { %v102_v23 = vadd.f32 %v101_v18, %v100_v20 }
  0x20   :  { %v104_v26 = vadd.f32 %v103_v21, %v102_v23 }
  0x22   :  { %v106_v28 = vadd.f32 %v105_v24, %v104_v26 }
  0x24   :  { %v108_v30 = vadd.f32 %v107_v27, %v106_v28 }
  0x26   :  { %v110_v31 = vadd.f32 %v109_v29, %v108_v30 }
  0x28   :  { %111 = vadd.xlane.f32.xlu0 %v110_v31 }
  0x9b   :  { %v112_v33 = vpop.xlane.xlu0 %111 }
  0x9c   :  { %v113_v34 = vadd.f32 %v112_v33, %v73_v32 }
  0x9e   :  { %115 = vst.msk [vmem:[#allocation2] sm:$0x3] %vm63_vm0, %v113_v34 }
  0xa5   :  { %v119_v35 = vld [vmem:[#allocation2] sm:$0x3] }
  0xa6   :  { %120 = vst.msk [vmem:[%s226_s2] sm:$0x3] %vm63_vm0, %v119_v35 }
  0xa7   :  { %125 = vsyncpa [#allocation4], 1 }
  0xa8   :  { %126 = vsyncpa [#allocation6], 1 }

</bundles_post_ra>
